<compile_context>
chip_gen: v6e
topology: v6e:2x2x1
jax: 0.10.0
libtpu: 0.0.40
codegen_flags: <defaults>
</compile_context>

<pallas_src>
import jax
import jax.numpy as jnp
from jax import lax
from jax.experimental import pallas as pl
from jax.experimental.pallas import tpu as pltpu

_LANE = 128


def _round_up(x, m):
    return ((x + m - 1) // m) * m


def _pre_predictions_kernel(h_ref, w_ref, b_ref, o_ref):
    """One grid step.

    h_ref : (TM, D)  activation tile (tokens / packed token-groups on sublanes)
    w_ref : (C, D)   fused (block-diagonal) weight, VMEM-resident across the grid
    b_ref : (C, 1)   fused bias, VMEM-resident
    o_ref : (C, TM)  lane-dense output tile (tokens on lanes)
    """
    # Contract both operands on D ("trans_b" / q@k^T pattern -> no big-tile transpose).
    acc = lax.dot_general(
        w_ref[...],
        h_ref[...],
        dimension_numbers=(((1,), (1,)), ((), ())),
        preferred_element_type=jnp.float32,
    )
    o_ref[...] = (acc + b_ref[...]).astype(o_ref.dtype)


def _choose_block_rows(n_rows, row_bytes):
    """Rows per grid block along the token(-group) axis.

    The value must be a multiple of 128 (it is the minor dim of the lane-dense output
    block) unless it equals n_rows exactly.  Target ~6 MiB of h per pipeline buffer so
    the ~0.35 us/step grid overhead is amortized, keep tiles >= ~512 KiB, and prefer an
    even step count (>= 8 when large) for pipelining + v7x megacore balance.
    """
    max_tile_bytes = 6 * 1024 * 1024
    min_tile_bytes = 512 * 1024
    tm_cap = max(_LANE, (max_tile_bytes // row_bytes) // _LANE * _LANE)
    if n_rows <= 2 * _LANE:
        return n_rows                        # tiny input: one full-array block (always legal)
    max_steps = max(1, (n_rows * row_bytes) // min_tile_bytes)
    min_steps = pl.cdiv(n_rows, tm_cap)
    steps = min(8, max_steps)
    steps = max(steps, min_steps, 2)
    if steps % 2:
        steps += 1
    tm = _round_up(pl.cdiv(n_rows, steps), _LANE)
    return max(_LANE, min(tm, tm_cap))


def _vmem_limit_bytes(tm, d, c, h_itemsize, out_itemsize):
    """Lane-padding-aware scoped-VMEM requirement (+ headroom)."""
    d_pad = _round_up(d, _LANE)
    c_pad = _round_up(c, 8)
    h_buf = _round_up(tm, 8) * d_pad * h_itemsize
    o_buf = c_pad * _round_up(tm, _LANE) * out_itemsize
    w_buf = c_pad * d_pad * 4
    b_buf = c_pad * _LANE * 4
    need = 2 * (h_buf + o_buf) + 2 * (w_buf + b_buf)      # double-buffered pipeline
    return int(min(max(need + (4 << 20), 16 << 20), 40 << 20))


def pre_predictions(h, w_e, b_e, w_c, b_c):
    """JAX wrapper reproducing Pre_Predictions.forward.

    h   : (B, S, H)   w_e, w_c : (2, H) (PyTorch nn.Linear layout)   b_e, b_c : (2,)
    returns (pred_e, pred_c), each (B, S, 2)
    """
    B, S, H = h.shape
    N = B * S
    dtype = h.dtype

    # Fused head parameters in native (out, in) layout: rows = [e0, e1, c0, c1].
    w_heads = jnp.concatenate([w_e, w_c], axis=0)          # (4, H)
    b_heads = jnp.concatenate([b_e, b_c], axis=0)          # (4,)

    # Lane-densify the h read path: pack P tokens per 128-lane row when possible.
    if H < _LANE and _LANE % H == 0 and N % (_LANE // H) == 0:
        P = _LANE // H
    else:
        P = 1
    D = H * P                       # lane width of h blocks
    C = 4 * P                       # rows of the fused lane-dense output
    Np = N // P                     # rows on the grid axis

    h_rows = h.reshape(Np, D)       # contiguous reshape: no HBM copy

    if P > 1:
        # Block-diagonal weight: block (t, t) = w_heads, so one matmul evaluates both
        # heads for every packed token.
        w_fused = jnp.kron(jnp.eye(P, dtype=w_heads.dtype), w_heads)   # (C, D)
        b_fused = jnp.tile(b_heads, P).reshape(C, 1)
    else:
        w_fused = w_heads                                               # (4, H)
        b_fused = b_heads.reshape(C, 1)
    w_fused = w_fused.astype(dtype)
    b_fused = b_fused.astype(jnp.float32)

    row_bytes = _round_up(D, _LANE) * h.dtype.itemsize
    TM = _choose_block_rows(Np, row_bytes)
    grid = (pl.cdiv(Np, TM),)       # no padding: trailing partial block is masked on writeback

    cost = pl.CostEstimate(
        flops=2 * N * H * 4,
        transcendentals=0,
        bytes_accessed=(N * H * h.dtype.itemsize
                        + N * 4 * jnp.dtype(dtype).itemsize
                        + C * D * jnp.dtype(dtype).itemsize
                        + C * 4),
    )

    out = pl.pallas_call(
        _pre_predictions_kernel,
        out_shape=jax.ShapeDtypeStruct((C, Np), dtype),
        grid=grid,
        in_specs=[
            pl.BlockSpec((TM, D), lambda i: (i, 0)),    # h tile streams per step (double-buffered)
            pl.BlockSpec((C, D), lambda i: (0, 0)),     # fused weight, VMEM-resident
            pl.BlockSpec((C, 1), lambda i: (0, 0)),     # fused bias, VMEM-resident
        ],
        out_specs=pl.BlockSpec((C, TM), lambda i: (0, i)),   # lane-dense output tile
        compiler_params=pltpu.CompilerParams(
            dimension_semantics=("parallel",),
            vmem_limit_bytes=_vmem_limit_bytes(
                TM, D, C, h.dtype.itemsize, jnp.dtype(dtype).itemsize),
        ),
        cost_estimate=cost,
    )(h_rows, w_fused, b_fused)

    # Tiny (C, Np) -> (N, 4) transpose/unpack outside the kernel, then split the heads.
    out_n4 = out.T.reshape(Np, P, 4).reshape(N, 4)
    pred_e = out_n4[:, 0:2].reshape(B, S, 2)
    pred_c = out_n4[:, 2:4].reshape(B, S, 2)
    return pred_e, pred_c


if __name__ == "__main__":
    # Small shapes consistent with the module: batch=2, seq=8, hidden_dim=32.
    B, S, H = 2, 8, 32

    key = jax.random.PRNGKey(0)
    k_h, k_we, k_be, k_wc, k_bc = jax.random.split(key, 5)

    h = jax.random.normal(k_h, (B, S, H), dtype=jnp.float32)

    # PyTorch nn.Linear parameter shapes: weight (2, H), bias (2,).
    bound = 1.0 / jnp.sqrt(H)
    w_e = jax.random.uniform(k_we, (2, H), jnp.float32, -bound, bound)
    b_e = jax.random.uniform(k_be, (2,), jnp.float32, -bound, bound)
    w_c = jax.random.uniform(k_wc, (2, H), jnp.float32, -bound, bound)
    b_c = jax.random.uniform(k_bc, (2,), jnp.float32, -bound, bound)

    pred_e, pred_c = pre_predictions(h, w_e, b_e, w_c, b_c)
    jax.block_until_ready((pred_e, pred_c))

    # Reference check against plain JAX (same semantics as the PyTorch module).
    ref_e = jnp.einsum("bsh,oh->bso", h, w_e) + b_e
    ref_c = jnp.einsum("bsh,oh->bso", h, w_c) + b_c
    assert pred_e.shape == (B, S, 2) and pred_c.shape == (B, S, 2)
    assert jnp.allclose(pred_e, ref_e, atol=1e-4, rtol=1e-4)
    assert jnp.allclose(pred_c, ref_c, atol=1e-4, rtol=1e-4)

    print("KERNEL_OK")
</pallas_src>

<mosaic_0001>
module attributes {stable_mosaic.version = 11 : i64} {
  func.func @_pre_predictions_kernel(%arg0: i32, %arg1: memref<4x128xf32, #tpu.memory_space<vmem>>, %arg2: memref<16x128xf32, #tpu.memory_space<vmem>>, %arg3: memref<16x1xf32, #tpu.memory_space<vmem>>, %arg4: memref<16x4xf32, #tpu.memory_space<vmem>>) attributes {dimension_semantics = [#tpu.dimension_semantics<parallel>], iteration_bounds = array<i64: 1>, scalar_prefetch = 0 : i64, scratch_operands = 0 : i64, tpu.core_type = #tpu.core_type<tc>, window_params = [{transform_indices = @transform_0, window_bounds = array<i64: 4, 128>}, {pipeline_mode = #tpu.pipeline_mode<synchronous>, transform_indices = @transform_1, window_bounds = array<i64: 16, 128>}, {pipeline_mode = #tpu.pipeline_mode<synchronous>, transform_indices = @transform_2, window_bounds = array<i64: 16, 1>}, {transform_indices = @transform_3, window_bounds = array<i64: 16, 4>}]} {
    %c0 = arith.constant 0 : index
    %c0_0 = arith.constant 0 : index
    %0 = vector.load %arg2[%c0, %c0_0] : memref<16x128xf32, #tpu.memory_space<vmem>>, vector<16x128xf32>
    %c0_1 = arith.constant 0 : index
    %c0_2 = arith.constant 0 : index
    %1 = vector.load %arg1[%c0_1, %c0_2] : memref<4x128xf32, #tpu.memory_space<vmem>>, vector<4x128xf32>
    %cst = arith.constant dense<0.000000e+00> : vector<16x4xf32>
    %2 = tpu.matmul %0, %1, %cst {dimension_numbers = #tpu.dot_dimension_numbers<[1], [1], [0], [0], [0, 0, 1, 0], [], []>} : vector<16x128xf32>, vector<4x128xf32>, vector<16x4xf32> -> vector<16x4xf32>
    %c0_3 = arith.constant 0 : index
    %c0_4 = arith.constant 0 : index
    %3 = vector.load %arg3[%c0_3, %c0_4] : memref<16x1xf32, #tpu.memory_space<vmem>>, vector<16x1xf32>
    %4 = vector.broadcast %3 : vector<16x1xf32> to vector<16x4xf32>
    %5 = arith.addf %2, %4 : vector<16x4xf32>
    %c0_5 = arith.constant 0 : index
    %c0_6 = arith.constant 0 : index
    %6 = vector.load %arg4[%c0_5, %c0_6] : memref<16x4xf32, #tpu.memory_space<vmem>>, vector<16x4xf32>
    tpu.vector_store %arg4[%c0_5, %c0_6], %5 {strides = array<i32>} : memref<16x4xf32, #tpu.memory_space<vmem>>, vector<16x4xf32>,
    return
  }
  func.func @transform_0(%arg0: i32) -> (i32, i32) {
    %c0_i32 = arith.constant 0 : i32
    %c0_i32_0 = arith.constant 0 : i32
    return %arg0, %c0_i32 : i32, i32
  }
  func.func @transform_1(%arg0: i32) -> (i32, i32) {
    %c0_i32 = arith.constant 0 : i32
    %c0_i32_0 = arith.constant 0 : i32
    %c0_i32_1 = arith.constant 0 : i32
    return %c0_i32, %c0_i32_0 : i32, i32
  }
  func.func @transform_2(%arg0: i32) -> (i32, i32) {
    %c0_i32 = arith.constant 0 : i32
    %c0_i32_0 = arith.constant 0 : i32
    %c0_i32_1 = arith.constant 0 : i32
    return %c0_i32, %c0_i32_0 : i32, i32
  }
  func.func @transform_3(%arg0: i32) -> (i32, i32) {
    %c0_i32 = arith.constant 0 : i32
    %c0_i32_0 = arith.constant 0 : i32
    return %c0_i32, %arg0 : i32, i32
  }
}

</mosaic_0001>

<bundles_post_ra>
// kernel: tpu_custom_call.1
= control target key start
LH: loop header
LB: loop body
LE: loop exit
PB: predicated region body
PF: predicated region fallthrough
CT: control target
= control target key end

     0   :  { %8 = vsyncpa [#allocation3], 0  ;;  %s157_s12 = smov [#allocation2]   ;;  %s200_s0 = inlined_call_operand.hbm [shape: f32[4,128], index: 0, kind: input, shape index: {}]   ;;  %s201_s1 = inlined_call_operand.vmem [shape: f32[16,128], index: 1, kind: input, shape index: {}]   ;;  %s202_s2 = inlined_call_operand.vmem [shape: f32[16,1], index: 2, kind: input, shape index: {}]   ;;  %s203_s3 = inlined_call_operand.vmem [shape: f32[16,4], index: 3, kind: output, shape index: {}]  }
   0x1   :  { %s15_s13 = sshll.u32 %s157_s12, 4  ;;  %s16_s13 = int_to_ptr.vmem [resolvable:$true] %s15_s13 }
   0x2   :  { %s143_s14 = scalar_lea.vmem %s16_s13, 64  ;;  %p148_p1 = scmp.lt.s32.totalorder %s16_s13, %s16_s13 }
   0x3   :  { %p144_p0 = scmp.ne.s32.totalorder %s16_s13, %s143_s14  ;;  %p149_p2 = scmp.lt.s32.totalorder %s143_s14, %s143_s14 }
   0x5   :  { %p150_p3 = por %p149_p2, %p148_p1 }
   0x7   :  { %p151_p4 = pnand %p150_p3, %p144_p0 }
   0x9   :  { %154 = shalt.err (!%p151_p4)
}
   0xa   :  { %18 = dma.hbm_to_vmem [thread:$0]  %s200_s0, 64, %s16_s13, [#allocation3]  }
   0xb   :  { %155 = dma.done.wait [#allocation3], 64  }
   0xc   :  { %156 = vsyncadd [#allocation3], 4294967232  ;;  %v158_v0 = vmov 0   ;;  %v28_v1 = vld [vmem:[#allocation2] sm:$0xf]  ;;  %v27_v4 = vld [vmem:[%s201_s1 + $0x8] sm:$0xff] }
   0xd   :  { %134 = vset.pattern.permute.xlu0 %v158_v0  ;;  %v26_v2 = vld [vmem:[%s201_s1] sm:$0xff]  ;;  %127 = vmatprep.subr.mxu0 %v28_v1  ;;  %v30_v5 = vld [vmem:[%s202_s2 + $0x8] sm:$0xff]  ;;  %vm116_vm0 = vcmask 31744  }
   0xe   :  { %129 = vmatprep.mubr.f32.mxu0 %v26_v2  ;;  %v29_v3 = vld [vmem:[%s202_s2] sm:$0xff]  ;;  %128 = vmatpush3.xpose.msra.mxu0 %v28_v1 }
   0xf   :  { %33 = vperm.xlu0 %134, %v29_v3  }
  0x11   :  { %130 = vmatmul.mubr.f32.vlgmr.msra.gmra.mxu0 %v27_v4 }
  0x13   :  { %38 = vperm.xlu0 %134, %v30_v5  }
  0x8a   :  { %v34_v6 = vpop.permute.xlu0 %33 }
  0x8e   :  { %v39_v7 = vpop.permute.xlu0 %38 }
  0xd1   :  { %v131_v8 = vpop.f32.mrf.mxu0 }
  0xd2   :  { %v113_v9 = vadd.f32 %v131_v8, %v39_v7 }
  0xd3   :  { %v107_v10 = vpop.f32.mrf.mxu0 }
  0xd4   :  { %118 = vst.msk [vmem:[%s203_s3 + $0x8] sm:$0xff] %vm116_vm0, %v113_v9  ;;  %v108_v11 = vadd.f32 %v107_v10, %v34_v6 }
  0xd6   :  { %117 = vst.msk [vmem:[%s203_s3] sm:$0xff] %vm116_vm0, %v108_v11 }
  0xd7   :  { %123 = vsyncpa [#allocation3], 1 }

</bundles_post_ra>
